<compile_context>
chip_gen: v5e
topology: v5e:2x2
jax: 0.10.0
libtpu: 0.0.40
codegen_flags: <defaults>
</compile_context>

<pallas_src>
import jax
import jax.numpy as jnp
from jax import lax
from jax.experimental import pallas as pl
from jax.experimental.pallas import tpu as pltpu

_HALO_ROWS = 8  # row-halo block height (sublane multiple); needs kh-1 <= 8


def _round_up(x, m):
    return (x + m - 1) // m * m


def _cdiv(a, b):
    return (a + b - 1) // b


def _vmem_budget_and_limit():
    """Generation-dependent VMEM sizing.

    v5e / v6e have 128 MiB physical VMEM -> large budget; v7x has 64 MiB per
    TensorCore -> conservative budget.  Falls back to the conservative numbers
    if the hardware query is unavailable.
    """
    try:
        cap = pltpu.get_tpu_info().vmem_capacity_bytes
    except Exception:  # pragma: no cover - query unavailable (emulator, etc.)
        cap = 64 * 1024 * 1024
    if cap >= 100 * 1024 * 1024:  # v5e / v6e class (128 MiB)
        return 48 * 1024 * 1024, 96 * 1024 * 1024
    return 20 * 1024 * 1024, 48 * 1024 * 1024  # v7x class (64 MiB / TC)


def _pick_strip(w_in, max_tile_rows):
    """Row-strip height so per-strip temporaries fit (mostly) in the vreg file."""
    if w_in <= 256:
        s = 32
    elif w_in <= 512:
        s = 16
    else:
        s = 8
    # Never exceed the requested tile cap (keeps TH a strip multiple).
    return max(8, min(s, (max(max_tile_rows, 8) // 8) * 8))


def _make_corr2d_kernel(kh, kw, strip, tile_rows, tw):
    """Kernel closure over the (static) kernel-window extents and tiling."""
    n_strips = tile_rows // strip
    rows = strip + _HALO_ROWS  # slab height per strip (covers kh-1 <= 8 extra rows)

    def taps(slab, w_ref, b_ref):
        # slab: (rows, W_in) f32; returns the (strip, tw) accumulator.
        # Fold bias and the (0,0) tap into the accumulator init.
        acc = slab[:strip, :tw] * w_ref[0] + b_ref[0]
        for a in range(kh):
            # Row shift via sublane roll on the small slab, trimmed to `strip`
            # rows *before* the lane rolls below.
            xa = slab[:strip] if a == 0 else pltpu.roll(slab, shift=rows - a, axis=0)[:strip]
            for b in range(kw):
                if a == 0 and b == 0:
                    continue
                # Column shift via lane roll (XLU slot); wrapped columns only
                # ever land at lane >= W_in - b >= Wo, i.e. in trimmed output.
                xab = xa if b == 0 else pltpu.roll(xa, shift=xa.shape[1] - b, axis=1)
                acc = acc + xab[:, :tw] * w_ref[a * kw + b]
        return acc

    def kernel(w_ref, b_ref, x_ref, halo_ref, o_ref):
        # Bulk strips: all needed input rows live inside x_ref (no halo).
        if n_strips > 1:
            def body(s, carry):
                r0 = pl.multiple_of(s * strip, strip)
                slab = x_ref[pl.ds(r0, rows), :]
                o_ref[pl.ds(r0, strip), :] = taps(slab, w_ref, b_ref)
                return carry

            lax.fori_loop(0, n_strips - 1, body, 0, unroll=min(n_strips - 1, 2))

        # Last strip: needs the 8-row halo from the next tile -> small concat
        # of (strip + 8, W_in) only (no full-tile copy).
        last = tile_rows - strip
        slab = jnp.concatenate(
            [x_ref[pl.ds(last, strip), :], halo_ref[...]], axis=0)
        o_ref[pl.ds(last, strip), :] = taps(slab, w_ref, b_ref)

    return kernel


def conv2d_forward(x, weight, bias, *, max_tile_rows=1024, trim_output=True):
    """Pallas equivalent of conv2d.forward(X): 2D cross-correlation + bias."""
    x = jnp.asarray(x, jnp.float32)
    weight = jnp.asarray(weight, jnp.float32)
    bias = jnp.asarray(bias, jnp.float32).reshape((1,))

    H, W = x.shape
    kh, kw = weight.shape
    Ho, Wo = H - kh + 1, W - kw + 1
    assert Ho > 0 and Wo > 0
    assert kh - 1 <= _HALO_ROWS, "row-halo scheme supports kh <= 9"

    # Lane-dense output tile width (multiple of 128 -> unmasked stores).
    TW = _round_up(Wo, 128)
    # Input width: reuse TW whenever it already covers every input column
    # (equivalent to TW - Wo >= kw - 1); otherwise pad up one more lane group.
    W_in = TW if TW >= W else _round_up(W, 128)
    # Lane-roll wraparound safety: wrapped columns must never reach a valid
    # output column (< Wo).  Holds because W_in >= W = Wo + kw - 1.
    assert W_in >= W and W_in >= TW and W_in - (kw - 1) >= Wo

    budget, vmem_limit = _vmem_budget_and_limit()
    strip = _pick_strip(W_in, max_tile_rows)

    # Largest tile height (multiple of `strip`) whose double-buffered working
    # set (main + halo + output blocks, f32) fits the budget, leaving a fixed
    # margin for the small in-kernel strip temporaries.
    margin = 2 * 1024 * 1024
    rows_budget = ((budget - margin) // (2 * 4) - _HALO_ROWS * W_in) // (W_in + TW)
    TH = max(strip, min(rows_budget, max_tile_rows) // strip * strip)
    TH = min(TH, _round_up(Ho, strip))
    if Ho >= 2 * strip:
        # Keep >= 2 grid steps so the "parallel" axis can use both TensorCores
        # on v7x (negligible cost on single-TC v5e/v6e).
        TH = min(TH, _round_up(_cdiv(Ho, 2), strip))
    TH = max(TH, strip)

    n_tiles = _cdiv(Ho, TH)
    H_out_pad = n_tiles * TH
    H_in = H_out_pad + _HALO_ROWS  # room for the last tile's halo block

    # Pad once (rows for the tile/halo grid, columns to lane width); skipped
    # entirely when the input already has the target shape.  Padded regions
    # only ever feed output rows/cols that are trimmed below.
    if (H_in, W_in) != (H, W):
        x_in = jnp.pad(x, ((0, H_in - H), (0, W_in - W)))
    else:
        x_in = x
    w_flat = weight.reshape(-1)  # 1D weight -> tiny SMEM footprint

    halo_blocks_per_tile = TH // _HALO_ROWS

    out_pad = pl.pallas_call(
        _make_corr2d_kernel(kh, kw, strip, TH, TW),
        out_shape=jax.ShapeDtypeStruct((H_out_pad, TW), jnp.float32),
        grid_spec=pltpu.PrefetchScalarGridSpec(
            num_scalar_prefetch=0,
            grid=(n_tiles,),
            in_specs=[
                pl.BlockSpec(memory_space=pltpu.MemorySpace.SMEM),  # weight (kh*kw,)
                pl.BlockSpec(memory_space=pltpu.MemorySpace.SMEM),  # bias   (1,)
                # main input rows [i*TH, (i+1)*TH)
                pl.BlockSpec((TH, W_in), lambda i: (i, 0)),
                # 8-row halo starting at element row (i+1)*TH (block index in 8-row units)
                pl.BlockSpec(
                    (_HALO_ROWS, W_in),
                    lambda i: ((i + 1) * halo_blocks_per_tile, 0),
                ),
            ],
            out_specs=pl.BlockSpec((TH, TW), lambda i: (i, 0)),
        ),
        compiler_params=pltpu.CompilerParams(
            dimension_semantics=("parallel",),  # shard row tiles across v7x's 2 TCs
            vmem_limit_bytes=vmem_limit,
        ),
    )(w_flat, bias, x_in, x_in)

    if not trim_output or (H_out_pad, TW) == (Ho, Wo):
        return out_pad
    return out_pad[:Ho, :Wo]


def conv2d_ref(x, weight, bias):
    """Pure-JAX reference (same loop semantics as the torch module)."""
    kh, kw = weight.shape
    Ho, Wo = x.shape[0] - kh + 1, x.shape[1] - kw + 1
    acc = jnp.zeros((Ho, Wo), jnp.float32)
    for a in range(kh):
        for b in range(kw):
            acc = acc + x[a:a + Ho, b:b + Wo] * weight[a, b]
    return acc + bias[0]


if __name__ == "__main__":
    key = jax.random.PRNGKey(0)
    k_x, k_w, k_x2, k_x3 = jax.random.split(key, 4)

    # Module __init__: weight ~ rand(kernel_size), bias = zeros(1)
    kernel_size = (3, 3)
    weight = jax.random.uniform(k_w, kernel_size, dtype=jnp.float32)
    bias = jnp.zeros((1,), dtype=jnp.float32)

    # Small 2D map consistent with the module's forward (corr2d takes a 2D map).
    x = jax.random.normal(k_x, (16, 16), dtype=jnp.float32)
    y = jax.block_until_ready(conv2d_forward(x, weight, bias))
    assert y.shape == (14, 14)
    assert jnp.allclose(y, conv2d_ref(x, weight, bias), atol=1e-5, rtol=1e-5)

    # Multi-tile path (>= 2 grid steps, halo crossing a tile boundary).
    x2 = jax.random.normal(k_x2, (64, 160), dtype=jnp.float32)
    y2 = jax.block_until_ready(conv2d_forward(x2, weight, bias, max_tile_rows=32))
    assert y2.shape == (62, 158)
    assert jnp.allclose(y2, conv2d_ref(x2, weight, bias), atol=1e-5, rtol=1e-5)

    # Multi-strip path (bulk fori_loop strips + halo tail) on a wider map.
    x3 = jax.random.normal(k_x3, (96, 300), dtype=jnp.float32)
    y3 = jax.block_until_ready(conv2d_forward(x3, weight, bias))
    assert y3.shape == (94, 298)
    assert jnp.allclose(y3, conv2d_ref(x3, weight, bias), atol=1e-5, rtol=1e-5)

    print("KERNEL_OK")
</pallas_src>

<mosaic_0001>
module attributes {stable_mosaic.version = 11 : i64} {
  func.func @kernel(%arg0: i32, %arg1: memref<9xf32, #tpu.memory_space<smem>>, %arg2: memref<1xf32, #tpu.memory_space<smem>>, %arg3: memref<32x128xf32, #tpu.memory_space<vmem>>, %arg4: memref<8x128xf32, #tpu.memory_space<vmem>>, %arg5: memref<32x128xf32, #tpu.memory_space<vmem>>) attributes {dimension_semantics = [#tpu.dimension_semantics<parallel>], iteration_bounds = array<i64: 1>, scalar_prefetch = 0 : i64, scratch_operands = 0 : i64, tpu.core_type = #tpu.core_type<tc>, window_params = [{transform_indices = @transform_0, window_bounds = array<i64: 9>}, {transform_indices = @transform_1, window_bounds = array<i64: 1>}, {transform_indices = @transform_2, window_bounds = array<i64: 32, 128>}, {transform_indices = @transform_3, window_bounds = array<i64: 8, 128>}, {transform_indices = @transform_4, window_bounds = array<i64: 32, 128>}]} {
    %c0 = arith.constant 0 : index
    %c0_0 = arith.constant 0 : index
    %0 = vector.load %arg3[%c0, %c0_0] : memref<32x128xf32, #tpu.memory_space<vmem>>, vector<32x128xf32>
    %c0_1 = arith.constant 0 : index
    %c0_2 = arith.constant 0 : index
    %1 = vector.load %arg4[%c0_1, %c0_2] : memref<8x128xf32, #tpu.memory_space<vmem>>, vector<8x128xf32>
    %2 = tpu.concatenate %0, %1 in 0 : vector<32x128xf32>, vector<8x128xf32> -> vector<40x128xf32>
    %3 = vector.extract_strided_slice %2 {offsets = [0, 0], sizes = [32, 128], strides = [1, 1]} : vector<40x128xf32> to vector<32x128xf32>
    %c0_3 = arith.constant 0 : index
    %4 = memref.load %arg1[%c0_3] : memref<9xf32, #tpu.memory_space<smem>>
    %5 = vector.broadcast %4 : f32 to vector<32x128xf32>
    %6 = arith.mulf %3, %5 : vector<32x128xf32>
    %c0_4 = arith.constant 0 : index
    %7 = memref.load %arg2[%c0_4] : memref<1xf32, #tpu.memory_space<smem>>
    %8 = vector.broadcast %7 : f32 to vector<32x128xf32>
    %9 = arith.addf %6, %8 : vector<32x128xf32>
    %10 = vector.extract_strided_slice %2 {offsets = [0, 0], sizes = [32, 128], strides = [1, 1]} : vector<40x128xf32> to vector<32x128xf32>
    %c127_i32 = arith.constant 127 : i32
    %11 = tpu.dynamic_rotate %10 by %c127_i32 dim 1 : vector<32x128xf32>, i32 -> vector<32x128xf32>
    %c1 = arith.constant 1 : index
    %12 = memref.load %arg1[%c1] : memref<9xf32, #tpu.memory_space<smem>>
    %13 = vector.broadcast %12 : f32 to vector<32x128xf32>
    %14 = arith.mulf %11, %13 : vector<32x128xf32>
    %15 = arith.addf %9, %14 : vector<32x128xf32>
    %c126_i32 = arith.constant 126 : i32
    %16 = tpu.dynamic_rotate %10 by %c126_i32 dim 1 : vector<32x128xf32>, i32 -> vector<32x128xf32>
    %c2 = arith.constant 2 : index
    %17 = memref.load %arg1[%c2] : memref<9xf32, #tpu.memory_space<smem>>
    %18 = vector.broadcast %17 : f32 to vector<32x128xf32>
    %19 = arith.mulf %16, %18 : vector<32x128xf32>
    %20 = arith.addf %15, %19 : vector<32x128xf32>
    %c39_i32 = arith.constant 39 : i32
    %21 = tpu.dynamic_rotate %2 by %c39_i32 dim 0 : vector<40x128xf32>, i32 -> vector<40x128xf32>
    %22 = vector.extract_strided_slice %21 {offsets = [0, 0], sizes = [32, 128], strides = [1, 1]} : vector<40x128xf32> to vector<32x128xf32>
    %c3 = arith.constant 3 : index
    %23 = memref.load %arg1[%c3] : memref<9xf32, #tpu.memory_space<smem>>
    %24 = vector.broadcast %23 : f32 to vector<32x128xf32>
    %25 = arith.mulf %22, %24 : vector<32x128xf32>
    %26 = arith.addf %20, %25 : vector<32x128xf32>
    %c127_i32_5 = arith.constant 127 : i32
    %27 = tpu.dynamic_rotate %22 by %c127_i32_5 dim 1 : vector<32x128xf32>, i32 -> vector<32x128xf32>
    %c4 = arith.constant 4 : index
    %28 = memref.load %arg1[%c4] : memref<9xf32, #tpu.memory_space<smem>>
    %29 = vector.broadcast %28 : f32 to vector<32x128xf32>
    %30 = arith.mulf %27, %29 : vector<32x128xf32>
    %31 = arith.addf %26, %30 : vector<32x128xf32>
    %c126_i32_6 = arith.constant 126 : i32
    %32 = tpu.dynamic_rotate %22 by %c126_i32_6 dim 1 : vector<32x128xf32>, i32 -> vector<32x128xf32>
    %c5 = arith.constant 5 : index
    %33 = memref.load %arg1[%c5] : memref<9xf32, #tpu.memory_space<smem>>
    %34 = vector.broadcast %33 : f32 to vector<32x128xf32>
    %35 = arith.mulf %32, %34 : vector<32x128xf32>
    %36 = arith.addf %31, %35 : vector<32x128xf32>
    %c38_i32 = arith.constant 38 : i32
    %37 = tpu.dynamic_rotate %2 by %c38_i32 dim 0 : vector<40x128xf32>, i32 -> vector<40x128xf32>
    %38 = vector.extract_strided_slice %37 {offsets = [0, 0], sizes = [32, 128], strides = [1, 1]} : vector<40x128xf32> to vector<32x128xf32>
    %c6 = arith.constant 6 : index
    %39 = memref.load %arg1[%c6] : memref<9xf32, #tpu.memory_space<smem>>
    %40 = vector.broadcast %39 : f32 to vector<32x128xf32>
    %41 = arith.mulf %38, %40 : vector<32x128xf32>
    %42 = arith.addf %36, %41 : vector<32x128xf32>
    %c127_i32_7 = arith.constant 127 : i32
    %43 = tpu.dynamic_rotate %38 by %c127_i32_7 dim 1 : vector<32x128xf32>, i32 -> vector<32x128xf32>
    %c7 = arith.constant 7 : index
    %44 = memref.load %arg1[%c7] : memref<9xf32, #tpu.memory_space<smem>>
    %45 = vector.broadcast %44 : f32 to vector<32x128xf32>
    %46 = arith.mulf %43, %45 : vector<32x128xf32>
    %47 = arith.addf %42, %46 : vector<32x128xf32>
    %c126_i32_8 = arith.constant 126 : i32
    %48 = tpu.dynamic_rotate %38 by %c126_i32_8 dim 1 : vector<32x128xf32>, i32 -> vector<32x128xf32>
    %c8 = arith.constant 8 : index
    %49 = memref.load %arg1[%c8] : memref<9xf32, #tpu.memory_space<smem>>
    %50 = vector.broadcast %49 : f32 to vector<32x128xf32>
    %51 = arith.mulf %48, %50 : vector<32x128xf32>
    %52 = arith.addf %47, %51 : vector<32x128xf32>
    %c0_9 = arith.constant 0 : index
    %c0_10 = arith.constant 0 : index
    %53 = vector.load %arg5[%c0_9, %c0_10] : memref<32x128xf32, #tpu.memory_space<vmem>>, vector<32x128xf32>
    tpu.vector_store %arg5[%c0_9, %c0_10], %52 {strides = array<i32>} : memref<32x128xf32, #tpu.memory_space<vmem>>, vector<32x128xf32>,
    return
  }
  func.func @transform_0(%arg0: i32) -> i32 {
    %c0_i32 = arith.constant 0 : i32
    %c0_i32_0 = arith.constant 0 : i32
    return %c0_i32 : i32
  }
  func.func @transform_1(%arg0: i32) -> i32 {
    %c0_i32 = arith.constant 0 : i32
    %c0_i32_0 = arith.constant 0 : i32
    return %c0_i32 : i32
  }
  func.func @transform_2(%arg0: i32) -> (i32, i32) {
    %c0_i32 = arith.constant 0 : i32
    %c0_i32_0 = arith.constant 0 : i32
    return %arg0, %c0_i32 : i32, i32
  }
  func.func @transform_3(%arg0: i32) -> (i32, i32) {
    %c1_i32 = arith.constant 1 : i32
    %0 = arith.addi %arg0, %c1_i32 : i32
    %c4_i32 = arith.constant 4 : i32
    %1 = arith.muli %0, %c4_i32 : i32
    %c0_i32 = arith.constant 0 : i32
    %c0_i32_0 = arith.constant 0 : i32
    return %1, %c0_i32 : i32, i32
  }
  func.func @transform_4(%arg0: i32) -> (i32, i32) {
    %c0_i32 = arith.constant 0 : i32
    %c0_i32_0 = arith.constant 0 : i32
    return %arg0, %c0_i32 : i32, i32
  }
}

</mosaic_0001>

<bundles_post_ra>
// kernel: tpu_custom_call.1
= control target key start
LH: loop header
LB: loop body
LE: loop exit
PB: predicated region body
PF: predicated region fallthrough
CT: control target
= control target key end

     0   :  { %10 = vsyncpa [#allocation6], 0  ;;  %s513_s0 = inlined_call_operand.vmem [shape: f32[9], index: 0, kind: input, shape index: {}]   ;;  %s514_s1 = inlined_call_operand.<no memory space> [shape: f32[1], index: 1, kind: input, shape index: {}]   ;;  %s515_s2 = inlined_call_operand.hbm [shape: f32[40,128], index: 2, kind: input, shape index: {}]   ;;  %s516_s3 = inlined_call_operand.hbm [shape: f32[40,128], index: 3, kind: input, shape index: {}]   ;;  %s517_s4 = inlined_call_operand.hbm [shape: f32[32,128], index: 4, kind: output, shape index: {}]  }
   0x1   :  { %11 = vsyncpa [#allocation4], 0 }
   0x2   :  { %12 = vsyncpa [#allocation9], 0 }
   0x3   :  { %13 = vsyncpa [#allocation5], 0  ;;  %s19_s17 = sshll.u32 %s513_s0, 4  ;;  %s29_s20 = sshll.u32 %s515_s2, 4  ;;  %s20_s17 = int_to_ptr.vmem [resolvable:$true] %s19_s17  ;;  %s30_s20 = int_to_ptr.hbm [resolvable:$true] %s29_s20 }
   0x4   :  { %s369_s21 = smov [#allocation3]   ;;  %s370_s22 = smov [#allocation7]  }
   0x5   :  { %22 = dma.vmem_to_smem %s20_s17, 16, %s369_s21, [#allocation6]  }
   0x6   :  { %s31_s23 = sshll.u32 %s370_s22, 4  ;;  %s371_s24 = smov 128   ;;  %s32_s23 = int_to_ptr.vmem [resolvable:$true] %s31_s23 }
   0x7   :  { %s372_s25 = smov 8   ;;  %s260_s0 = scalar_lea.hbm %s516_s3, 32 }
   0x8   :  { %37 = dma.hbm_to_vmem [thread:$0]  %s30_s20, 512, %s32_s23, [#allocation4], %s371_s24, %s371_s24, %s372_s25  }
   0x9   :  { %s47_s28 = sshll.u32 %s260_s0, 4  ;;  %s373_s29 = smov [#allocation8]   ;;  %s48_s28 = int_to_ptr.hbm [resolvable:$true] %s47_s28 }
   0xa   :  { %s49_s30 = sshll.u32 %s373_s29, 4  ;;  %s50_s30 = int_to_ptr.vmem [resolvable:$true] %s49_s30 }
   0xb   :  { %52 = dma.hbm_to_vmem [thread:$0]  %s48_s28, 128, %s50_s30, [#allocation9]  }
   0xc   :  { %361 = dma.done.wait [#allocation6], 16  }
   0xd   :  { %362 = vsyncadd [#allocation6], 4294967280 }
   0xe   :  { %363 = dma.done.wait [#allocation4], 512  }
   0xf   :  { %364 = vsyncadd [#allocation4], 4294966784 }
  0x10   :  { %365 = dma.done.wait [#allocation9], 128  }
  0x11   :  { %366 = vsyncadd [#allocation9], 4294967168 }
  0x12   :  { %65 = sfence }
  0x13   :  { %v414_v0 = vld [vmem:[#allocation7 + $0x10] sm:$0xff]  ;;  %v416_v1 = vld [vmem:[#allocation7] sm:$0xff]  ;;  %s374_s2 = smov 127   ;;  %s375_s3 = smov 126   ;;  %v424_v2 = vld [vmem:[#allocation7 + $0x18] sm:$0xff]  ;;  %v126_v4 = vlaneseq  ;;  %v80_v35 = vstv %s514_s1 }
  0x14   :  { %89 = vrot.lane.b32.xlu1 %v414_v0, %s374_s2  ;;  %85 = vrot.lane.b32.xlu0 %v416_v1, %s374_s2  ;;  %v426_v3 = vld [vmem:[#allocation7 + $0x8] sm:$0xff]  ;;  %v121_v6 = vrot.slane %v416_v1, 1  ;;  %v123_v9 = vrot.slane %v414_v0, 1  ;;  %v124_v10 = vrot.slane %v424_v2, 1  ;;  %v72_v11 = vld [vmem:[#allocation8] sm:$0xff]  ;;  %v179_v16 = vrot.slane %v416_v1, 2 }
  0x15   :  { %103 = vrot.lane.b32.xlu2 %v416_v1, %s375_s3  ;;  %v127_v5 = vshrl.u32 %v126_v4, 7  ;;  %v122_v7 = vrot.slane %v426_v3, 1  ;;  %v125_v12 = vrot.slane %v72_v11, 1  ;;  %v180_v17 = vrot.slane %v426_v3, 2  ;;  %s73_s5 = sld [smem:[#allocation3]]  ;;  %s376_s15 = smov [#allocation10]  }
  0x16   :  { %v181_v19 = vrot.slane %v414_v0, 2  ;;  %v182_v21 = vrot.slane %v424_v2, 2  ;;  %v183_v22 = vrot.slane %v72_v11, 2  ;;  %s261_s6 = sld [smem:[#allocation3 + $0x1]]  ;;  %s243_s16 = sshll.u32 %s376_s15, 4  ;;  %s244_s16 = int_to_ptr.vmem [resolvable:$true] %s243_s16 }
  0x17   :  { %vm128_vm0 = vcmp.lt.s32.totalorder %v127_v5, 7  ;;  %vm184_vm1 = vcmp.lt.s32.totalorder %v127_v5, 6  ;;  %s262_s7 = sld [smem:[#allocation3 + $0x2]]  ;;  %s245_s19 = sshll.u32 %s517_s4, 4  ;;  %s246_s19 = int_to_ptr.hbm [resolvable:$true] %s245_s19 }
  0x18   :  { %v436_v8 = vsel %vm128_vm0, %v121_v6, %v122_v7  ;;  %v446_v13 = vsel %vm128_vm0, %v123_v9, %v124_v10  ;;  %v448_v14 = vsel %vm128_vm0, %v122_v7, %v123_v9  ;;  %v454_v15 = vsel %vm128_vm0, %v124_v10, %v125_v12  ;;  %s263_s8 = sld [smem:[#allocation3 + $0x3]] }
  0x19   :  { %v466_v18 = vsel %vm184_vm1, %v179_v16, %v180_v17  ;;  %v473_v20 = vsel %vm184_vm1, %v180_v17, %v181_v19  ;;  %v478_v23 = vsel %vm184_vm1, %v182_v21, %v183_v22  ;;  %v186_v24 = vsel %vm184_vm1, %v181_v19, %v182_v21  ;;  %s265_s11 = sld [smem:[#allocation3 + $0x5]] }
  0x1a   :  { %s266_s12 = sld [smem:[#allocation3 + $0x6]] }
  0x1b   :  { %v74_v31 = vstv %s73_s5  ;;  %s264_s13 = sld [smem:[#allocation3 + $0x4]] }
  0x1c   :  { %91 = vrot.lane.b32.xlu1 %v424_v2, %s374_s2  ;;  %87 = vrot.lane.b32.xlu0 %v426_v3, %s374_s2  ;;  %v77_v34 = vmul.f32 %v74_v31, %v414_v0  ;;  %v94_v36 = vstv %s261_s6  ;;  %v75_v37 = vmul.f32 %v74_v31, %v416_v1  ;;  %v76_v40 = vmul.f32 %v74_v31, %v426_v3  ;;  %s268_s1 = sld [smem:[#allocation3 + $0x8]] }
  0x1d   :  { %105 = vrot.lane.b32.xlu2 %v426_v3, %s375_s3  ;;  %v112_v42 = vstv %s262_s7  ;;  %v78_v58 = vmul.f32 %v74_v31, %v424_v2  ;;  %s267_s14 = sld [smem:[#allocation3 + $0x7]] }
  0x1e   :  { %v83_v38 = vadd.f32 %v80_v35, %v77_v34  ;;  %v81_v43 = vadd.f32 %v80_v35, %v75_v37  ;;  %v82_v49 = vadd.f32 %v80_v35, %v76_v40  ;;  %v134_v51 = vstv %s263_s8 }
  0x1f   :  { %v137_v53 = vmul.f32 %v134_v51, %v446_v13  ;;  %v170_v56 = vstv %s265_s11  ;;  %v135_v60 = vmul.f32 %v134_v51, %v436_v8  ;;  %v136_v6 = vmul.f32 %v134_v51, %v448_v14 }
  0x20   :  { %v190_v57 = vstv %s266_s12  ;;  %v84_v10 = vadd.f32 %v80_v35, %v78_v58 }
  0x21   :  { %v152_v62 = vstv %s264_s13  ;;  %v193_v7 = vmul.f32 %v190_v57, %v186_v24 }
  0x24   :  { %109 = vrot.lane.b32.xlu1 %v424_v2, %s375_s3  ;;  %107 = vrot.lane.b32.xlu0 %v414_v0, %s375_s3 }
  0x25   :  { %143 = vrot.lane.b32.xlu2 %v436_v8, %s374_s2 }
  0x2c   :  { %147 = vrot.lane.b32.xlu1 %v446_v13, %s374_s2  ;;  %145 = vrot.lane.b32.xlu0 %v448_v14, %s374_s2 }
  0x2d   :  { %149 = vrot.lane.b32.xlu2 %v454_v15, %s374_s2 }
  0x34   :  { %163 = vrot.lane.b32.xlu1 %v448_v14, %s375_s3  ;;  %161 = vrot.lane.b32.xlu0 %v436_v8, %s375_s3  ;;  %v192_v14 = vmul.f32 %v190_v57, %v473_v20 }
  0x35   :  { %165 = vrot.lane.b32.xlu2 %v446_v13, %s375_s3 }
  0x3c   :  { %199 = vrot.lane.b32.xlu1 %v466_v18, %s374_s2  ;;  %167 = vrot.lane.b32.xlu0 %v454_v15, %s375_s3 }
  0x3d   :  { %201 = vrot.lane.b32.xlu2 %v473_v20, %s374_s2 }
  0x44   :  { %205 = vrot.lane.b32.xlu1 %v478_v23, %s374_s2  ;;  %203 = vrot.lane.b32.xlu0 %v186_v24, %s374_s2 }
  0x45   :  { %217 = vrot.lane.b32.xlu2 %v466_v18, %s375_s3 }
  0x4c   :  { %221 = vrot.lane.b32.xlu1 %v186_v24, %s375_s3  ;;  %219 = vrot.lane.b32.xlu0 %v473_v20, %s375_s3  ;;  %v208_v20 = vstv %s267_s14 }
  0x4d   :  { %223 = vrot.lane.b32.xlu2 %v478_v23, %s375_s3 }
  0x6f   :  { %v104_v25 = vpop.permute.xlu2 %103 }
  0x70   :  { %v113_v55 = vmul.f32 %v112_v42, %v104_v25 }
  0x77   :  { %v106_v26 = vpop.permute.xlu2 %105 }
  0x78   :  { %v114_v1 = vmul.f32 %v112_v42, %v106_v26  ;;  %v191_v26 = vmul.f32 %v190_v57, %v466_v18 }
  0x7f   :  { %v144_v27 = vpop.permute.xlu2 %143 }
  0x80   :  { %v153_v16 = vmul.f32 %v152_v62, %v144_v27 }
  0x86   :  { %v90_v28 = vpop.permute.xlu1 %89  ;;  %v86_v29 = vpop.permute.xlu0 %85 }
  0x87   :  { %v490_v30 = vpop.permute.xlu2 %149  ;;  %v97_v39 = vmul.f32 %v94_v36, %v90_v28  ;;  %v95_v44 = vmul.f32 %v94_v36, %v86_v29  ;;  %v138_v28 = vmul.f32 %v134_v51, %v454_v15  ;;  %v194_v15 = vmul.f32 %v190_v57, %v478_v23 }
  0x89   :  { %v101_v48 = vadd.f32 %v97_v39, %v83_v38  ;;  %v99_v52 = vadd.f32 %v95_v44, %v81_v43  ;;  %v156_v39 = vmul.f32 %v152_v62, %v490_v30 }
  0x8b   :  { %v117_v61 = vadd.f32 %v113_v55, %v99_v52 }
  0x8d   :  { %v139_v2 = vadd.f32 %v135_v60, %v117_v61 }
  0x8e   :  { %v92_v32 = vpop.permute.xlu1 %91  ;;  %v88_v33 = vpop.permute.xlu0 %87 }
  0x8f   :  { %v166_v41 = vpop.permute.xlu2 %165  ;;  %v96_v50 = vmul.f32 %v94_v36, %v88_v33  ;;  %v98_v11 = vmul.f32 %v94_v36, %v92_v32  ;;  %v157_v24 = vadd.f32 %v153_v16, %v139_v2 }
  0x90   :  { %v173_v5 = vmul.f32 %v170_v56, %v166_v41  ;;  %v226_v41 = vstv %s268_s1 }
  0x91   :  { %v100_v59 = vadd.f32 %v96_v50, %v82_v49  ;;  %v102_v21 = vadd.f32 %v98_v11, %v84_v10 }
  0x93   :  { %v118_v12 = vadd.f32 %v114_v1, %v100_v59 }
  0x95   :  { %v140_v22 = vadd.f32 %v136_v6, %v118_v12 }
  0x96   :  { %v110_v45 = vpop.permute.xlu1 %109  ;;  %v108_v46 = vpop.permute.xlu0 %107 }
  0x97   :  { %v115_v47 = vmul.f32 %v112_v42, %v108_v46  ;;  %v202_v9 = vpop.permute.xlu2 %201  ;;  %v116_v17 = vmul.f32 %v112_v42, %v110_v45 }
  0x98   :  { %v210_v59 = vmul.f32 %v208_v20, %v202_v9 }
  0x99   :  { %v119_v54 = vadd.f32 %v115_v47, %v101_v48  ;;  %v120_v32 = vadd.f32 %v116_v17, %v102_v21 }
  0x9b   :  { %v141_v3 = vadd.f32 %v137_v53, %v119_v54  ;;  %v142_v38 = vadd.f32 %v138_v28, %v120_v32 }
  0x9d   :  { %v160_v44 = vadd.f32 %v156_v39, %v142_v38 }
  0x9e   :  { %v148_v63 = vpop.permute.xlu1 %147  ;;  %v146_v0 = vpop.permute.xlu0 %145 }
  0x9f   :  { %v155_v4 = vmul.f32 %v152_v62, %v148_v63  ;;  %v154_v8 = vmul.f32 %v152_v62, %v146_v0  ;;  %v218_v37 = vpop.permute.xlu2 %217 }
  0xa0   :  { %v227_v47 = vmul.f32 %v226_v41, %v218_v37 }
  0xa1   :  { %v159_v13 = vadd.f32 %v155_v4, %v141_v3  ;;  %v158_v33 = vadd.f32 %v154_v8, %v140_v22 }
  0xa3   :  { %v177_v19 = vadd.f32 %v173_v5, %v159_v13 }
  0xa5   :  { %v197_v25 = vadd.f32 %v193_v7, %v177_v19 }
  0xa6   :  { %v164_v29 = vpop.permute.xlu1 %163  ;;  %v162_v31 = vpop.permute.xlu0 %161 }
  0xa7   :  { %v172_v27 = vmul.f32 %v170_v56, %v164_v29  ;;  %v171_v34 = vmul.f32 %v170_v56, %v162_v31  ;;  %v224_v52 = vpop.permute.xlu2 %223 }
  0xa8   :  { %v230_v55 = vmul.f32 %v226_v41, %v224_v52 }
  0xa9   :  { %v176_v35 = vadd.f32 %v172_v27, %v158_v33  ;;  %v175_v36 = vadd.f32 %v171_v34, %v157_v24 }
  0xab   :  { %v196_v40 = vadd.f32 %v192_v14, %v176_v35  ;;  %v195_v18 = vadd.f32 %v191_v26, %v175_v36 }
  0xad   :  { %v214_v62 = vadd.f32 %v210_v59, %v196_v40 }
  0xae   :  { %v200_v42 = vpop.permute.xlu1 %199  ;;  %v168_v43 = vpop.permute.xlu0 %167 }
  0xaf   :  { %v209_v45 = vmul.f32 %v208_v20, %v200_v42  ;;  %v174_v46 = vmul.f32 %v170_v56, %v168_v43 }
  0xb1   :  { %v213_v48 = vadd.f32 %v209_v45, %v195_v18  ;;  %v178_v49 = vadd.f32 %v174_v46, %v160_v44 }
  0xb3   :  { %v231_v50 = vadd.f32 %v227_v47, %v213_v48  ;;  %v198_v51 = vadd.f32 %v194_v15, %v178_v49 }
  0xb5   :  { %235 = vst [vmem:[#allocation10] sm:$0xff] %v231_v50 }
  0xb6   :  { %v206_v53 = vpop.permute.xlu1 %205  ;;  %v204_v30 = vpop.permute.xlu0 %203 }
  0xb7   :  { %v212_v54 = vmul.f32 %v208_v20, %v206_v53  ;;  %v211_v23 = vmul.f32 %v208_v20, %v204_v30 }
  0xb9   :  { %v216_v58 = vadd.f32 %v212_v54, %v198_v51  ;;  %v215_v56 = vadd.f32 %v211_v23, %v197_v25 }
  0xbb   :  { %v234_v57 = vadd.f32 %v230_v55, %v216_v58 }
  0xbd   :  { %238 = vst [vmem:[#allocation10 + $0x18] sm:$0xff] %v234_v57 }
  0xbe   :  { %v222_v60 = vpop.permute.xlu1 %221  ;;  %v220_v61 = vpop.permute.xlu0 %219 }
  0xbf   :  { %v229_v63 = vmul.f32 %v226_v41, %v222_v60  ;;  %v228_v0 = vmul.f32 %v226_v41, %v220_v61 }
  0xc1   :  { %v233_v1 = vadd.f32 %v229_v63, %v215_v56  ;;  %v232_v3 = vadd.f32 %v228_v0, %v214_v62 }
  0xc3   :  { %237 = vst [vmem:[#allocation10 + $0x10] sm:$0xff] %v233_v1 }
  0xc4   :  { %236 = vst [vmem:[#allocation10 + $0x8] sm:$0xff] %v232_v3 }
  0xc5   :  { %251 = dma.vmem_to_hbm [thread:$0]  %s244_s16, 512, %s246_s19, [#allocation5], %s371_s24, %s371_s24, %s372_s25  }
  0xc6   :  { %367 = dma.done.wait [#allocation5], 512  }
  0xc7   :  { %368 = vsyncadd [#allocation5], 4294966784 }
  0xc8   :  { %256 = vsyncpa [#allocation4], 1 }
  0xc9   :  { %257 = vsyncpa [#allocation9], 1 }
  0xca   :  { %258 = vsyncpa [#allocation5], 1 }
  0xcb   :  { %259 = vsyncpa [#allocation6], 1 }

</bundles_post_ra>
